<compile_context>
chip_gen: v5e
topology: v5e:2x2
jax: 0.10.0
libtpu: 0.0.40
codegen_flags: <defaults>
</compile_context>

<pallas_src>
import functools
import math

import jax
import jax.numpy as jnp
from jax import lax
from jax.experimental import pallas as pl
from jax.experimental.pallas import tpu as pltpu


# ---------------------------------------------------------------------------
# Fused kernel: projection + flash attention + FC accumulation
# ---------------------------------------------------------------------------
def _mhsa_kernel(q_ref, k_ref, v_ref,
                 wq_ref, bq_ref, wk_ref, bk_ref, wv_ref, bv_ref,
                 wfc_ref, bfc_ref,
                 o_ref,
                 q_scr, m_scr, l_scr, acc_scr,
                 *, scale):
    h = pl.program_id(2)
    kv = pl.program_id(3)
    n_kv = pl.num_programs(3)

    # ---- init the resident (tq, E) output block once per (batch, q-tile) ----
    @pl.when((h == 0) & (kv == 0))
    def _():
        o_ref[0] = jnp.broadcast_to(bfc_ref[...], o_ref.shape[1:]).astype(o_ref.dtype)

    # ---- per (q-tile, head): project + pre-scale Q once, reset softmax state ----
    @pl.when(kv == 0)
    def _():
        q = q_ref[0, 0].astype(jnp.bfloat16)                       # (tq, D)
        qp = jnp.dot(q, wq_ref[...],
                     preferred_element_type=jnp.float32) + bq_ref[...]
        q_scr[...] = (qp * scale).astype(jnp.bfloat16)
        m_scr[...] = jnp.full_like(m_scr, -jnp.inf)
        l_scr[...] = jnp.zeros_like(l_scr)
        acc_scr[...] = jnp.zeros_like(acc_scr)

    # ---- project current K/V tile (bf16 MXU operands, f32 accumulation) ----
    k = k_ref[0, 0].astype(jnp.bfloat16)                           # (tk, D)
    v = v_ref[0, 0].astype(jnp.bfloat16)                           # (tk, D)
    kp = (jnp.dot(k, wk_ref[...], preferred_element_type=jnp.float32)
          + bk_ref[...]).astype(jnp.bfloat16)
    vp = (jnp.dot(v, wv_ref[...], preferred_element_type=jnp.float32)
          + bv_ref[...]).astype(jnp.bfloat16)

    # ---- scores (tq, tk): contract last dims, K consumed "transposed" natively ----
    s = lax.dot_general(q_scr[...], kp, (((1,), (1,)), ((), ())),
                        preferred_element_type=jnp.float32)

    # ---- online softmax update (f32) ----
    m_prev = m_scr[...]
    m_new = jnp.maximum(m_prev, jnp.max(s, axis=-1, keepdims=True))
    alpha = jnp.exp(m_prev - m_new)
    p = jnp.exp(s - m_new)
    l_scr[...] = alpha * l_scr[...] + jnp.sum(p, axis=-1, keepdims=True)
    acc_scr[...] = alpha * acc_scr[...] + jnp.dot(
        p.astype(jnp.bfloat16), vp, preferred_element_type=jnp.float32)
    m_scr[...] = m_new

    # ---- finalize head: normalize and fuse the FC slice into the (tq, E) output ----
    @pl.when(kv == n_kv - 1)
    def _():
        out_h = acc_scr[...] * pl.reciprocal(l_scr[...], approx=True)   # (tq, D)
        o_ref[0] += jnp.dot(out_h.astype(jnp.bfloat16), wfc_ref[0],
                            preferred_element_type=jnp.float32).astype(o_ref.dtype)


def _vmem_estimate_bytes(tq, tk, D, E):
    f32, bf16, dbl = 4, 2, 2
    b = dbl * (tq * D) * f32                    # q block
    b += dbl * 2 * (tk * D) * f32               # k, v blocks
    b += dbl * (3 * D * D + D * E) * bf16       # weights
    b += dbl * (3 * D + E) * f32                # biases
    b += dbl * (tq * E) * f32                   # output block
    b += tq * D * bf16 + 2 * tq * f32 + tq * D * f32   # scratch
    return b


# ---------------------------------------------------------------------------
# Wrapper
# ---------------------------------------------------------------------------
def self_attention_forward(query, key, value, params, emb_dim, heads,
                           *, tq=None, tk=None):
    """Forward pass of SelfAttention (kind=None, mask=None)."""
    B, S, E = query.shape
    assert E == emb_dim
    H = heads
    D = emb_dim // heads

    # Tile sizes: re-derive per generation (v7x: 64 MiB VMEM; v5e/v6e: 128 MiB).
    if tq is None:
        tq = min(S, 256)
    if tk is None:
        tk = min(S, 256)
    assert S % tq == 0 and S % tk == 0, (S, tq, tk)
    assert tq == S or tq % 8 == 0
    assert tk == S or tk % 8 == 0

    # (B, S, E) -> (B, H, S, D): contiguous per-head slabs for the BlockSpec DMA.
    def split_heads(x):
        return jnp.transpose(x.reshape(B, S, H, D), (0, 2, 1, 3))

    q_bhsd = split_heads(query)
    k_bhsd = split_heads(key)
    v_bhsd = split_heads(value)

    # Pre-transpose weights to (in, out) and pre-cast to bf16 (no in-kernel .T).
    wq_t = params["wq"].T.astype(jnp.bfloat16)                 # (D, D)
    wk_t = params["wk"].T.astype(jnp.bfloat16)                 # (D, D)
    wv_t = params["wv"].T.astype(jnp.bfloat16)                 # (D, D)
    wfc_t = params["wfc"].T.reshape(H, D, E).astype(jnp.bfloat16)  # (H, D, E)
    bq = params["bq"].reshape(1, D).astype(jnp.float32)
    bk = params["bk"].reshape(1, D).astype(jnp.float32)
    bv = params["bv"].reshape(1, D).astype(jnp.float32)
    bfc = params["bfc"].reshape(1, E).astype(jnp.float32)

    scale = 1.0 / math.sqrt(float(emb_dim))   # module divides by emb_dim ** 0.5

    grid = (B, S // tq, H, S // tk)

    q_spec = pl.BlockSpec((1, 1, tq, D), lambda b, qi, h, kv: (b, h, qi, 0))
    kv_spec = pl.BlockSpec((1, 1, tk, D), lambda b, qi, h, kv: (b, h, kv, 0))
    w_spec = pl.BlockSpec((D, D), lambda b, qi, h, kv: (0, 0))
    b_spec = pl.BlockSpec((1, D), lambda b, qi, h, kv: (0, 0))
    wfc_spec = pl.BlockSpec((1, D, E), lambda b, qi, h, kv: (h, 0, 0))
    bfc_spec = pl.BlockSpec((1, E), lambda b, qi, h, kv: (0, 0))
    out_spec = pl.BlockSpec((1, tq, E), lambda b, qi, h, kv: (b, qi, 0))

    vmem_limit = int(min(64 * 2**20,
                         max(32 * 2**20, 2 * _vmem_estimate_bytes(tq, tk, D, E))))

    return pl.pallas_call(
        functools.partial(_mhsa_kernel, scale=scale),
        out_shape=jax.ShapeDtypeStruct((B, S, E), jnp.float32),
        grid_spec=pltpu.PrefetchScalarGridSpec(
            num_scalar_prefetch=0,
            grid=grid,
            in_specs=[q_spec, kv_spec, kv_spec,
                      w_spec, b_spec, w_spec, b_spec, w_spec, b_spec,
                      wfc_spec, bfc_spec],
            out_specs=out_spec,
            scratch_shapes=[
                pltpu.VMEM((tq, D), jnp.bfloat16),   # projected+scaled Q
                pltpu.VMEM((tq, 1), jnp.float32),    # m (running max)
                pltpu.VMEM((tq, 1), jnp.float32),    # l (running denom)
                pltpu.VMEM((tq, D), jnp.float32),    # acc (running numerator)
            ]),
        compiler_params=pltpu.CompilerParams(
            dimension_semantics=("parallel", "parallel", "arbitrary", "arbitrary"),
            vmem_limit_bytes=vmem_limit),
    )(q_bhsd, k_bhsd, v_bhsd,
      wq_t, bq, wk_t, bk, wv_t, bv, wfc_t, bfc)


# ---------------------------------------------------------------------------
# Parameter setup (deterministic, synthetic); spectral_norm reproduced exactly
# via W / sigma_max(W) (PyTorch's power iteration converges to the same value).
# ---------------------------------------------------------------------------
def _linear_init(key, out_features, in_features):
    bound = 1.0 / math.sqrt(in_features)
    kw, kb = jax.random.split(key)
    w = jax.random.uniform(kw, (out_features, in_features),
                           minval=-bound, maxval=bound, dtype=jnp.float32)
    b = jax.random.uniform(kb, (out_features,),
                           minval=-bound, maxval=bound, dtype=jnp.float32)
    return w, b


def _spectral_normalize(w):
    sigma = jnp.linalg.svd(w, compute_uv=False)[0]
    return w / sigma


def make_params(key, emb_dim, heads, spectral=True):
    D = emb_dim // heads
    k1, k2, k3, k4 = jax.random.split(key, 4)
    wq, bq = _linear_init(k1, D, D)
    wk, bk = _linear_init(k2, D, D)
    wv, bv = _linear_init(k3, D, D)
    wfc, bfc = _linear_init(k4, emb_dim, heads * D)
    if spectral:
        wq, wk, wv, wfc = map(_spectral_normalize, (wq, wk, wv, wfc))
    return dict(wq=wq, bq=bq, wk=wk, bk=bk, wv=wv, bv=bv, wfc=wfc, bfc=bfc)


# ---------------------------------------------------------------------------
# Pure-JAX f32 reference (mirrors the PyTorch forward) for validation
# ---------------------------------------------------------------------------
def reference_forward(query, key, value, params, emb_dim, heads):
    B, S, E = query.shape
    D = emb_dim // heads
    q = query.reshape(B, S, heads, D)
    k = key.reshape(B, S, heads, D)
    v = value.reshape(B, S, heads, D)
    Q = jnp.einsum("nshd,ed->nshe", q, params["wq"]) + params["bq"]
    K = jnp.einsum("nshd,ed->nshe", k, params["wk"]) + params["bk"]
    V = jnp.einsum("nshd,ed->nshe", v, params["wv"]) + params["bv"]
    key_out = jnp.einsum("nqhd,nkhd->nhqk", Q, K)
    attn = jax.nn.softmax(key_out / math.sqrt(emb_dim), axis=3)
    out = jnp.einsum("nhql,nlhd->nqhd", attn, V).reshape(B, S, heads * D)
    return jnp.einsum("nse,fe->nsf", out, params["wfc"]) + params["bfc"]


# ---------------------------------------------------------------------------
if __name__ == "__main__":
    B, S, emb_dim, heads = 2, 8, 32, 2

    key = jax.random.PRNGKey(0)
    kq, kk, kv, kp = jax.random.split(key, 4)
    query = jax.random.normal(kq, (B, S, emb_dim), dtype=jnp.float32)
    key_in = jax.random.normal(kk, (B, S, emb_dim), dtype=jnp.float32)
    value = jax.random.normal(kv, (B, S, emb_dim), dtype=jnp.float32)

    params = make_params(kp, emb_dim, heads, spectral=True)

    out = self_attention_forward(query, key_in, value, params, emb_dim, heads)
    out = jax.block_until_ready(out)

    ref = reference_forward(query, key_in, value, params, emb_dim, heads)
    assert out.shape == (B, S, emb_dim), out.shape
    # bf16 MXU operands (f32 accumulation) + approx reciprocal -> slightly looser tol.
    max_err = float(jnp.max(jnp.abs(out - ref)))
    assert jnp.allclose(out, ref, atol=2e-2, rtol=2e-2), max_err

    print("KERNEL_OK")
</pallas_src>

<mosaic_0001>
module attributes {stable_mosaic.version = 11 : i64} {
  func.func @_mhsa_kernel(%arg0: i32, %arg1: i32, %arg2: i32, %arg3: i32, %arg4: memref<1x1x8x16xf32, #tpu.memory_space<vmem>>, %arg5: memref<1x1x8x16xf32, #tpu.memory_space<vmem>>, %arg6: memref<1x1x8x16xf32, #tpu.memory_space<vmem>>, %arg7: memref<16x16xbf16, #tpu.memory_space<vmem>>, %arg8: memref<1x16xf32, #tpu.memory_space<vmem>>, %arg9: memref<16x16xbf16, #tpu.memory_space<vmem>>, %arg10: memref<1x16xf32, #tpu.memory_space<vmem>>, %arg11: memref<16x16xbf16, #tpu.memory_space<vmem>>, %arg12: memref<1x16xf32, #tpu.memory_space<vmem>>, %arg13: memref<1x16x32xbf16, #tpu.memory_space<vmem>>, %arg14: memref<1x32xf32, #tpu.memory_space<vmem>>, %arg15: memref<1x8x32xf32, #tpu.memory_space<vmem>>, %arg16: memref<8x16xbf16, #tpu.memory_space<vmem>>, %arg17: memref<8x1xf32, #tpu.memory_space<vmem>>, %arg18: memref<8x1xf32, #tpu.memory_space<vmem>>, %arg19: memref<8x16xf32, #tpu.memory_space<vmem>>) attributes {dimension_semantics = [#tpu.dimension_semantics<parallel>, #tpu.dimension_semantics<parallel>, #tpu.dimension_semantics<arbitrary>, #tpu.dimension_semantics<arbitrary>], iteration_bounds = array<i64: 2, 1, 2, 1>, scalar_prefetch = 0 : i64, scratch_operands = 4 : i64, tpu.core_type = #tpu.core_type<tc>, window_params = [{transform_indices = @transform_0, window_bounds = array<i64: 1, 1, 8, 16>}, {transform_indices = @transform_1, window_bounds = array<i64: 1, 1, 8, 16>}, {transform_indices = @transform_2, window_bounds = array<i64: 1, 1, 8, 16>}, {pipeline_mode = #tpu.pipeline_mode<synchronous>, transform_indices = @transform_3, window_bounds = array<i64: 16, 16>}, {pipeline_mode = #tpu.pipeline_mode<synchronous>, transform_indices = @transform_4, window_bounds = array<i64: 1, 16>}, {pipeline_mode = #tpu.pipeline_mode<synchronous>, transform_indices = @transform_5, window_bounds = array<i64: 16, 16>}, {pipeline_mode = #tpu.pipeline_mode<synchronous>, transform_indices = @transform_6, window_bounds = array<i64: 1, 16>}, {pipeline_mode = #tpu.pipeline_mode<synchronous>, transform_indices = @transform_7, window_bounds = array<i64: 16, 16>}, {pipeline_mode = #tpu.pipeline_mode<synchronous>, transform_indices = @transform_8, window_bounds = array<i64: 1, 16>}, {transform_indices = @transform_9, window_bounds = array<i64: 1, 16, 32>}, {pipeline_mode = #tpu.pipeline_mode<synchronous>, transform_indices = @transform_10, window_bounds = array<i64: 1, 32>}, {transform_indices = @transform_11, window_bounds = array<i64: 1, 8, 32>}]} {
    %c0_i32 = arith.constant 0 : i32
    %0 = arith.cmpi eq, %arg2, %c0_i32 : i32
    %c0_i32_0 = arith.constant 0 : i32
    %1 = arith.cmpi eq, %arg3, %c0_i32_0 : i32
    %2 = arith.andi %0, %1 : i1
    %3 = arith.extui %2 : i1 to i32
    %c0_i32_1 = arith.constant 0 : i32
    %4 = arith.cmpi ne, %3, %c0_i32_1 : i32
    scf.if %4 {
      %c0_40 = arith.constant 0 : index
      %c0_41 = arith.constant 0 : index
      %54 = vector.load %arg14[%c0_40, %c0_41] : memref<1x32xf32, #tpu.memory_space<vmem>>, vector<1x32xf32>
      %55 = vector.shape_cast %54 : vector<1x32xf32> to vector<1x32xf32>
      %56 = vector.broadcast %55 : vector<1x32xf32> to vector<8x32xf32>
      %c0_42 = arith.constant 0 : index
      %c0_43 = arith.constant 0 : index
      %c0_44 = arith.constant 0 : index
      %57 = vector.load %arg15[%c0_42, %c0_43, %c0_44] : memref<1x8x32xf32, #tpu.memory_space<vmem>>, vector<1x8x32xf32>
      %58 = vector.shape_cast %57 : vector<1x8x32xf32> to vector<8x32xf32>
      %59 = vector.shape_cast %56 : vector<8x32xf32> to vector<1x8x32xf32>
      tpu.vector_store %arg15[%c0_42, %c0_43, %c0_44], %59 {strides = array<i32>} : memref<1x8x32xf32, #tpu.memory_space<vmem>>, vector<1x8x32xf32>,
    } else {
    }
    %c0_i32_2 = arith.constant 0 : i32
    %5 = arith.cmpi eq, %arg3, %c0_i32_2 : i32
    %6 = arith.extui %5 : i1 to i32
    %c0_i32_3 = arith.constant 0 : i32
    %7 = arith.cmpi ne, %6, %c0_i32_3 : i32
    scf.if %7 {
      %c0_40 = arith.constant 0 : index
      %c0_41 = arith.constant 0 : index
      %c0_42 = arith.constant 0 : index
      %c0_43 = arith.constant 0 : index
      %54 = vector.load %arg4[%c0_40, %c0_41, %c0_42, %c0_43] : memref<1x1x8x16xf32, #tpu.memory_space<vmem>>, vector<1x1x8x16xf32>
      %55 = vector.shape_cast %54 : vector<1x1x8x16xf32> to vector<8x16xf32>
      %56 = arith.truncf %55 : vector<8x16xf32> to vector<8x16xbf16>
      %c0_44 = arith.constant 0 : index
      %c0_45 = arith.constant 0 : index
      %57 = vector.load %arg7[%c0_44, %c0_45] : memref<16x16xbf16, #tpu.memory_space<vmem>>, vector<16x16xbf16>
      %cst_46 = arith.constant dense<0.000000e+00> : vector<8x16xf32>
      %58 = tpu.matmul %56, %57, %cst_46 {dimension_numbers = #tpu.dot_dimension_numbers<[1], [0], [0], [1], [0, 0, 1, 1], [], []>} : vector<8x16xbf16>, vector<16x16xbf16>, vector<8x16xf32> -> vector<8x16xf32>
      %c0_47 = arith.constant 0 : index
      %c0_48 = arith.constant 0 : index
      %59 = vector.load %arg8[%c0_47, %c0_48] : memref<1x16xf32, #tpu.memory_space<vmem>>, vector<1x16xf32>
      %60 = vector.broadcast %59 : vector<1x16xf32> to vector<8x16xf32>
      %61 = arith.addf %58, %60 : vector<8x16xf32>
      %cst_49 = arith.constant 0.176776692 : f32
      %62 = vector.broadcast %cst_49 : f32 to vector<8x16xf32>
      %63 = arith.mulf %61, %62 : vector<8x16xf32>
      %64 = arith.truncf %63 : vector<8x16xf32> to vector<8x16xbf16>
      %c0_50 = arith.constant 0 : index
      %c0_51 = arith.constant 0 : index
      %65 = vector.load %arg16[%c0_50, %c0_51] : memref<8x16xbf16, #tpu.memory_space<vmem>>, vector<8x16xbf16>
      tpu.vector_store %arg16[%c0_50, %c0_51], %64 {strides = array<i32>} : memref<8x16xbf16, #tpu.memory_space<vmem>>, vector<8x16xbf16>,
      %cst_52 = arith.constant 0xFF800000 : f32
      %66 = vector.broadcast %cst_52 : f32 to vector<8x1xf32>
      %c0_53 = arith.constant 0 : index
      %c0_54 = arith.constant 0 : index
      %67 = vector.load %arg17[%c0_53, %c0_54] : memref<8x1xf32, #tpu.memory_space<vmem>>, vector<8x1xf32>
      tpu.vector_store %arg17[%c0_53, %c0_54], %66 {strides = array<i32>} : memref<8x1xf32, #tpu.memory_space<vmem>>, vector<8x1xf32>,
      %cst_55 = arith.constant 0.000000e+00 : f32
      %68 = vector.broadcast %cst_55 : f32 to vector<8x1xf32>
      %c0_56 = arith.constant 0 : index
      %c0_57 = arith.constant 0 : index
      %69 = vector.load %arg18[%c0_56, %c0_57] : memref<8x1xf32, #tpu.memory_space<vmem>>, vector<8x1xf32>
      tpu.vector_store %arg18[%c0_56, %c0_57], %68 {strides = array<i32>} : memref<8x1xf32, #tpu.memory_space<vmem>>, vector<8x1xf32>,
      %cst_58 = arith.constant 0.000000e+00 : f32
      %70 = vector.broadcast %cst_58 : f32 to vector<8x16xf32>
      %c0_59 = arith.constant 0 : index
      %c0_60 = arith.constant 0 : index
      %71 = vector.load %arg19[%c0_59, %c0_60] : memref<8x16xf32, #tpu.memory_space<vmem>>, vector<8x16xf32>
      tpu.vector_store %arg19[%c0_59, %c0_60], %70 {strides = array<i32>} : memref<8x16xf32, #tpu.memory_space<vmem>>, vector<8x16xf32>,
    } else {
    }
    %c0 = arith.constant 0 : index
    %c0_4 = arith.constant 0 : index
    %c0_5 = arith.constant 0 : index
    %c0_6 = arith.constant 0 : index
    %8 = vector.load %arg5[%c0, %c0_4, %c0_5, %c0_6] : memref<1x1x8x16xf32, #tpu.memory_space<vmem>>, vector<1x1x8x16xf32>
    %9 = vector.shape_cast %8 : vector<1x1x8x16xf32> to vector<8x16xf32>
    %10 = arith.truncf %9 : vector<8x16xf32> to vector<8x16xbf16>
    %c0_7 = arith.constant 0 : index
    %c0_8 = arith.constant 0 : index
    %c0_9 = arith.constant 0 : index
    %c0_10 = arith.constant 0 : index
    %11 = vector.load %arg6[%c0_7, %c0_8, %c0_9, %c0_10] : memref<1x1x8x16xf32, #tpu.memory_space<vmem>>, vector<1x1x8x16xf32>
    %12 = vector.shape_cast %11 : vector<1x1x8x16xf32> to vector<8x16xf32>
    %13 = arith.truncf %12 : vector<8x16xf32> to vector<8x16xbf16>
    %c0_11 = arith.constant 0 : index
    %c0_12 = arith.constant 0 : index
    %14 = vector.load %arg9[%c0_11, %c0_12] : memref<16x16xbf16, #tpu.memory_space<vmem>>, vector<16x16xbf16>
    %cst = arith.constant dense<0.000000e+00> : vector<8x16xf32>
    %15 = tpu.matmul %10, %14, %cst {dimension_numbers = #tpu.dot_dimension_numbers<[1], [0], [0], [1], [0, 0, 1, 1], [], []>} : vector<8x16xbf16>, vector<16x16xbf16>, vector<8x16xf32> -> vector<8x16xf32>
    %c0_13 = arith.constant 0 : index
    %c0_14 = arith.constant 0 : index
    %16 = vector.load %arg10[%c0_13, %c0_14] : memref<1x16xf32, #tpu.memory_space<vmem>>, vector<1x16xf32>
    %17 = vector.broadcast %16 : vector<1x16xf32> to vector<8x16xf32>
    %18 = arith.addf %15, %17 : vector<8x16xf32>
    %19 = arith.truncf %18 : vector<8x16xf32> to vector<8x16xbf16>
    %c0_15 = arith.constant 0 : index
    %c0_16 = arith.constant 0 : index
    %20 = vector.load %arg11[%c0_15, %c0_16] : memref<16x16xbf16, #tpu.memory_space<vmem>>, vector<16x16xbf16>
    %cst_17 = arith.constant dense<0.000000e+00> : vector<8x16xf32>
    %21 = tpu.matmul %13, %20, %cst_17 {dimension_numbers = #tpu.dot_dimension_numbers<[1], [0], [0], [1], [0, 0, 1, 1], [], []>} : vector<8x16xbf16>, vector<16x16xbf16>, vector<8x16xf32> -> vector<8x16xf32>
    %c0_18 = arith.constant 0 : index
    %c0_19 = arith.constant 0 : index
    %22 = vector.load %arg12[%c0_18, %c0_19] : memref<1x16xf32, #tpu.memory_space<vmem>>, vector<1x16xf32>
    %23 = vector.broadcast %22 : vector<1x16xf32> to vector<8x16xf32>
    %24 = arith.addf %21, %23 : vector<8x16xf32>
    %25 = arith.truncf %24 : vector<8x16xf32> to vector<8x16xbf16>
    %c0_20 = arith.constant 0 : index
    %c0_21 = arith.constant 0 : index
    %26 = vector.load %arg16[%c0_20, %c0_21] : memref<8x16xbf16, #tpu.memory_space<vmem>>, vector<8x16xbf16>
    %cst_22 = arith.constant dense<0.000000e+00> : vector<8x8xf32>
    %27 = tpu.matmul %26, %19, %cst_22 {dimension_numbers = #tpu.dot_dimension_numbers<[1], [1], [0], [0], [0, 0, 1, 0], [], []>} : vector<8x16xbf16>, vector<8x16xbf16>, vector<8x8xf32> -> vector<8x8xf32>
    %c0_23 = arith.constant 0 : index
    %c0_24 = arith.constant 0 : index
    %28 = vector.load %arg17[%c0_23, %c0_24] : memref<8x1xf32, #tpu.memory_space<vmem>>, vector<8x1xf32>
    %cst_25 = arith.constant dense<0xFF800000> : vector<8xf32>
    %29 = vector.multi_reduction <maximumf>, %27, %cst_25 [1] : vector<8x8xf32> to vector<8xf32>
    %30 = vector.shape_cast %29 : vector<8xf32> to vector<8x1xf32>
    %31 = arith.maximumf %28, %30 : vector<8x1xf32>
    %32 = arith.subf %28, %31 : vector<8x1xf32>
    %33 = math.exp %32 : vector<8x1xf32>
    %34 = vector.broadcast %31 : vector<8x1xf32> to vector<8x8xf32>
    %35 = arith.subf %27, %34 : vector<8x8xf32>
    %36 = math.exp %35 : vector<8x8xf32>
    %c0_26 = arith.constant 0 : index
    %c0_27 = arith.constant 0 : index
    %37 = vector.load %arg18[%c0_26, %c0_27] : memref<8x1xf32, #tpu.memory_space<vmem>>, vector<8x1xf32>
    %38 = arith.mulf %33, %37 : vector<8x1xf32>
    %cst_28 = arith.constant dense<0.000000e+00> : vector<8xf32>
    %39 = vector.multi_reduction <add>, %36, %cst_28 [1] : vector<8x8xf32> to vector<8xf32>
    %40 = vector.shape_cast %39 : vector<8xf32> to vector<8x1xf32>
    %41 = arith.addf %38, %40 : vector<8x1xf32>
    %c0_29 = arith.constant 0 : index
    %c0_30 = arith.constant 0 : index
    %42 = vector.load %arg18[%c0_29, %c0_30] : memref<8x1xf32, #tpu.memory_space<vmem>>, vector<8x1xf32>
    tpu.vector_store %arg18[%c0_29, %c0_30], %41 {strides = array<i32>} : memref<8x1xf32, #tpu.memory_space<vmem>>, vector<8x1xf32>,
    %c0_31 = arith.constant 0 : index
    %c0_32 = arith.constant 0 : index
    %43 = vector.load %arg19[%c0_31, %c0_32] : memref<8x16xf32, #tpu.memory_space<vmem>>, vector<8x16xf32>
    %44 = vector.broadcast %33 : vector<8x1xf32> to vector<8x16xf32>
    %45 = arith.mulf %44, %43 : vector<8x16xf32>
    %46 = arith.truncf %36 : vector<8x8xf32> to vector<8x8xbf16>
    %cst_33 = arith.constant dense<0.000000e+00> : vector<8x16xf32>
    %47 = tpu.matmul %46, %25, %cst_33 {dimension_numbers = #tpu.dot_dimension_numbers<[1], [0], [0], [1], [0, 0, 1, 1], [], []>} : vector<8x8xbf16>, vector<8x16xbf16>, vector<8x16xf32> -> vector<8x16xf32>
    %48 = arith.addf %45, %47 : vector<8x16xf32>
    %c0_34 = arith.constant 0 : index
    %c0_35 = arith.constant 0 : index
    %49 = vector.load %arg19[%c0_34, %c0_35] : memref<8x16xf32, #tpu.memory_space<vmem>>, vector<8x16xf32>
    tpu.vector_store %arg19[%c0_34, %c0_35], %48 {strides = array<i32>} : memref<8x16xf32, #tpu.memory_space<vmem>>, vector<8x16xf32>,
    %c0_36 = arith.constant 0 : index
    %c0_37 = arith.constant 0 : index
    %50 = vector.load %arg17[%c0_36, %c0_37] : memref<8x1xf32, #tpu.memory_space<vmem>>, vector<8x1xf32>
    tpu.vector_store %arg17[%c0_36, %c0_37], %31 {strides = array<i32>} : memref<8x1xf32, #tpu.memory_space<vmem>>, vector<8x1xf32>,
    %c0_i32_38 = arith.constant 0 : i32
    %51 = arith.cmpi eq, %arg3, %c0_i32_38 : i32
    %52 = arith.extui %51 : i1 to i32
    %c0_i32_39 = arith.constant 0 : i32
    %53 = arith.cmpi ne, %52, %c0_i32_39 : i32
    scf.if %53 {
      %c0_40 = arith.constant 0 : index
      %c0_41 = arith.constant 0 : index
      %54 = vector.load %arg19[%c0_40, %c0_41] : memref<8x16xf32, #tpu.memory_space<vmem>>, vector<8x16xf32>
      %c0_42 = arith.constant 0 : index
      %c0_43 = arith.constant 0 : index
      %55 = vector.load %arg18[%c0_42, %c0_43] : memref<8x1xf32, #tpu.memory_space<vmem>>, vector<8x1xf32>
      %56 = tpu.reciprocal %55 {approx = true} : vector<8x1xf32> -> vector<8x1xf32>
      %57 = vector.broadcast %56 : vector<8x1xf32> to vector<8x16xf32>
      %58 = arith.mulf %54, %57 : vector<8x16xf32>
      %c0_44 = arith.constant 0 : index
      %c0_45 = arith.constant 0 : index
      %c0_46 = arith.constant 0 : index
      %59 = vector.load %arg15[%c0_44, %c0_45, %c0_46] : memref<1x8x32xf32, #tpu.memory_space<vmem>>, vector<1x8x32xf32>
      %60 = vector.shape_cast %59 : vector<1x8x32xf32> to vector<8x32xf32>
      %61 = arith.truncf %58 : vector<8x16xf32> to vector<8x16xbf16>
      %c0_47 = arith.constant 0 : index
      %c0_48 = arith.constant 0 : index
      %c0_49 = arith.constant 0 : index
      %62 = vector.load %arg13[%c0_47, %c0_48, %c0_49] : memref<1x16x32xbf16, #tpu.memory_space<vmem>>, vector<1x16x32xbf16>
      %63 = vector.shape_cast %62 : vector<1x16x32xbf16> to vector<16x32xbf16>
      %cst_50 = arith.constant dense<0.000000e+00> : vector<8x32xf32>
      %64 = tpu.matmul %61, %63, %cst_50 {dimension_numbers = #tpu.dot_dimension_numbers<[1], [0], [0], [1], [0, 0, 1, 1], [], []>} : vector<8x16xbf16>, vector<16x32xbf16>, vector<8x32xf32> -> vector<8x32xf32>
      %65 = arith.addf %60, %64 : vector<8x32xf32>
      %c0_51 = arith.constant 0 : index
      %c0_52 = arith.constant 0 : index
      %c0_53 = arith.constant 0 : index
      %66 = vector.load %arg15[%c0_51, %c0_52, %c0_53] : memref<1x8x32xf32, #tpu.memory_space<vmem>>, vector<1x8x32xf32>
      %67 = vector.shape_cast %66 : vector<1x8x32xf32> to vector<8x32xf32>
      %68 = vector.shape_cast %65 : vector<8x32xf32> to vector<1x8x32xf32>
      tpu.vector_store %arg15[%c0_51, %c0_52, %c0_53], %68 {strides = array<i32>} : memref<1x8x32xf32, #tpu.memory_space<vmem>>, vector<1x8x32xf32>,
    } else {
    }
    return
  }
  func.func @transform_0(%arg0: i32, %arg1: i32, %arg2: i32, %arg3: i32) -> (i32, i32, i32, i32) {
    %c0_i32 = arith.constant 0 : i32
    %c0_i32_0 = arith.constant 0 : i32
    return %arg0, %arg2, %arg1, %c0_i32 : i32, i32, i32, i32
  }
  func.func @transform_1(%arg0: i32, %arg1: i32, %arg2: i32, %arg3: i32) -> (i32, i32, i32, i32) {
    %c0_i32 = arith.constant 0 : i32
    %c0_i32_0 = arith.constant 0 : i32
    return %arg0, %arg2, %arg3, %c0_i32 : i32, i32, i32, i32
  }
  func.func @transform_2(%arg0: i32, %arg1: i32, %arg2: i32, %arg3: i32) -> (i32, i32, i32, i32) {
    %c0_i32 = arith.constant 0 : i32
    %c0_i32_0 = arith.constant 0 : i32
    return %arg0, %arg2, %arg3, %c0_i32 : i32, i32, i32, i32
  }
  func.func @transform_3(%arg0: i32, %arg1: i32, %arg2: i32, %arg3: i32) -> (i32, i32) {
    %c0_i32 = arith.constant 0 : i32
    %c0_i32_0 = arith.constant 0 : i32
    %c0_i32_1 = arith.constant 0 : i32
    return %c0_i32, %c0_i32_0 : i32, i32
  }
  func.func @transform_4(%arg0: i32, %arg1: i32, %arg2: i32, %arg3: i32) -> (i32, i32) {
    %c0_i32 = arith.constant 0 : i32
    %c0_i32_0 = arith.constant 0 : i32
    %c0_i32_1 = arith.constant 0 : i32
    return %c0_i32, %c0_i32_0 : i32, i32
  }
  func.func @transform_5(%arg0: i32, %arg1: i32, %arg2: i32, %arg3: i32) -> (i32, i32) {
    %c0_i32 = arith.constant 0 : i32
    %c0_i32_0 = arith.constant 0 : i32
    %c0_i32_1 = arith.constant 0 : i32
    return %c0_i32, %c0_i32_0 : i32, i32
  }
  func.func @transform_6(%arg0: i32, %arg1: i32, %arg2: i32, %arg3: i32) -> (i32, i32) {
    %c0_i32 = arith.constant 0 : i32
    %c0_i32_0 = arith.constant 0 : i32
    %c0_i32_1 = arith.constant 0 : i32
    return %c0_i32, %c0_i32_0 : i32, i32
  }
  func.func @transform_7(%arg0: i32, %arg1: i32, %arg2: i32, %arg3: i32) -> (i32, i32) {
    %c0_i32 = arith.constant 0 : i32
    %c0_i32_0 = arith.constant 0 : i32
    %c0_i32_1 = arith.constant 0 : i32
    return %c0_i32, %c0_i32_0 : i32, i32
  }
  func.func @transform_8(%arg0: i32, %arg1: i32, %arg2: i32, %arg3: i32) -> (i32, i32) {
    %c0_i32 = arith.constant 0 : i32
    %c0_i32_0 = arith.constant 0 : i32
    %c0_i32_1 = arith.constant 0 : i32
    return %c0_i32, %c0_i32_0 : i32, i32
  }
  func.func @transform_9(%arg0: i32, %arg1: i32, %arg2: i32, %arg3: i32) -> (i32, i32, i32) {
    %c0_i32 = arith.constant 0 : i32
    %c0_i32_0 = arith.constant 0 : i32
    %c0_i32_1 = arith.constant 0 : i32
    return %arg2, %c0_i32, %c0_i32_0 : i32, i32, i32
  }
  func.func @transform_10(%arg0: i32, %arg1: i32, %arg2: i32, %arg3: i32) -> (i32, i32) {
    %c0_i32 = arith.constant 0 : i32
    %c0_i32_0 = arith.constant 0 : i32
    %c0_i32_1 = arith.constant 0 : i32
    return %c0_i32, %c0_i32_0 : i32, i32
  }
  func.func @transform_11(%arg0: i32, %arg1: i32, %arg2: i32, %arg3: i32) -> (i32, i32, i32) {
    %c0_i32 = arith.constant 0 : i32
    %c0_i32_0 = arith.constant 0 : i32
    return %arg0, %arg1, %c0_i32 : i32, i32, i32
  }
}

</mosaic_0001>

<bundles_post_ra>
// kernel: tpu_custom_call.1
= control target key start
LH: loop header
LB: loop body
LE: loop exit
PB: predicated region body
PF: predicated region fallthrough
CT: control target
= control target key end

     0   :  { %s2135_s0 = inlined_call_operand.hbm [shape: f32[2,2,8,16], index: 0, kind: input, shape index: {}]   ;;  %s2136_s1 = inlined_call_operand.hbm [shape: f32[2,2,8,16], index: 1, kind: input, shape index: {}]   ;;  %s2137_s2 = inlined_call_operand.hbm [shape: f32[2,2,8,16], index: 2, kind: input, shape index: {}]   ;;  %s2138_s3 = inlined_call_operand.hbm [shape: bf16[16,16], index: 3, kind: input, shape index: {}]   ;;  %s2139_s4 = inlined_call_operand.vmem [shape: f32[1,16], index: 4, kind: input, shape index: {}]   ;;  %s2140_s5 = inlined_call_operand.hbm [shape: bf16[16,16], index: 5, kind: input, shape index: {}]   ;;  %s2141_s6 = inlined_call_operand.vmem [shape: f32[1,16], index: 6, kind: input, shape index: {}]   ;;  %s2142_s7 = inlined_call_operand.hbm [shape: bf16[16,16], index: 7, kind: input, shape index: {}]   ;;  %s2143_s8 = inlined_call_operand.vmem [shape: f32[1,16], index: 8, kind: input, shape index: {}]   ;;  %s2144_s9 = inlined_call_operand.hbm [shape: bf16[2,16,32], index: 9, kind: input, shape index: {}]   ;;  %s2145_s10 = inlined_call_operand.vmem [shape: f32[1,32], index: 10, kind: input, shape index: {}]   ;;  %s2146_s11 = inlined_call_operand.hbm [shape: f32[2,8,32], index: 11, kind: output, shape index: {}]  }
   0x1   :  { %2167 = sst [smem:[#allocation41_spill]] %s2135_s0 }
   0x2   :  { %2168 = sst [smem:[#allocation42_spill]] %s2136_s1 }
   0x3   :  { %2169 = sst [smem:[#allocation43_spill]] %s2137_s2 }
   0x4   :  { %2170 = sst [smem:[#allocation44_spill]] %s2138_s3 }
   0x5   :  { %2171 = sst [smem:[#allocation45_spill]] %s2139_s4 }
   0x6   :  { %2172 = sst [smem:[#allocation46_spill]] %s2141_s6 }
   0x7   :  { %2173 = sst [smem:[#allocation47_spill]] %s2143_s8 }
   0x8   :  { %2174 = sst [smem:[#allocation48_spill]] %s2145_s10 }
   0x9   :  { %2175 = sst [smem:[#allocation49_spill]] %s2146_s11 }
   0xa   :  { %16 = vsyncpa [#allocation7], 0 }
   0xb   :  { %18 = vsyncpa [#allocation7 + $0x1], 0 }
   0xc   :  { %19 = vsyncpa [#allocation10], 0 }
   0xd   :  { %21 = vsyncpa [#allocation10 + $0x1], 0 }
   0xe   :  { %22 = vsyncpa [#allocation13], 0 }
   0xf   :  { %23 = vsyncpa [#allocation16], 0 }
  0x10   :  { %24 = vsyncpa [#allocation8], 0 }
  0x11   :  { %26 = vsyncpa [#allocation8 + $0x1], 0  ;;  %s1751_s17 = smov 0   ;;  %s1753_s18 = smov 0  }
  0x12   :  { %s1755_s19 = smov 0   ;;  %s1757_s20 = smov 0  }
  0x13   :  { %s1759_s21 = smov 0   ;;  %s1761_s22 = smov 0  }
  0x14   :  { %s1763_s23 = smov 0   ;;  %s1765_s24 = smov 0  }
  0x15   :  { %s1767_s25 = smov 0   ;;  %s1769_s26 = smov 0  }
  0x16   :  { %s1771_s27 = smov 0   ;;  %s1773_s28 = smov 0  }
  0x17   :  { %s1775_s29 = smov 0   ;;  %s1777_s30 = smov 0  }
  0x18 LB: > { %2176 = sst [smem:[#allocation25_spill]] %s1629_s17  ;;  %s1822_s12 = sadd.s32 4294967295, %s1681_s30   ;;  %s1681_s30 = sphi %s1777_s30, %s32_s30   ;;  %s1677_s29 = sphi %s1775_s29, %s2243_s29   ;;  %s1673_s28 = sphi %s1773_s28, %s2242_s28   ;;  %s1669_s27 = sphi %s1771_s27, %s2232_s27   ;;  %s1665_s26 = sphi %s1769_s26, %s2241_s26   ;;  %s1661_s25 = sphi %s1767_s25, %s2231_s25   ;;  %s1657_s24 = sphi %s1765_s24, %s2240_s24   ;;  %s1653_s23 = sphi %s1763_s23, %s2239_s23   ;;  %s1649_s22 = sphi %s1761_s22, %s2238_s22   ;;  %s1645_s21 = sphi %s1759_s21, %s2237_s21   ;;  %s1641_s20 = sphi %s1757_s20, %s2228_s20   ;;  %s1637_s19 = sphi %s1755_s19, %s2236_s19   ;;  %s1633_s18 = sphi %s1753_s18, %s2235_s18   ;;  %s1629_s17 = sphi %s1751_s17, %s2226_s17  }
  0x19   : > { %2177 = sst [smem:[#allocation26_spill]] %s1633_s18  ;;  %s1059_s13 = sadd.s32 4294967294, %s1681_s30  }
  0x1a   : > { %2178 = sst [smem:[#allocation27_spill]] %s1645_s21  ;;  %p83_p0 = scmp.eq.s32.totalorder %s1822_s12, 0 }
  0x1b   : > { %2179 = sst [smem:[#allocation28_spill]] %s1661_s25  ;;  %p340_p1 = scmp.ne.s32.totalorder %s1637_s19, %s1633_s18 }
  0x1c   : > { %2180 = sst [smem:[#allocation29_spill]] %s1665_s26  ;;  %p341_p2 = scmp.eq.s32.totalorder %s1822_s12, 3 }
  0x1d   : > { %2181 = sst [smem:[#allocation30_spill]] %s1669_s27  ;;  %p346_p3 = scmp.ne.s32.totalorder %s1633_s18, %s1629_s17 }
  0x1e   : > { %2182 = sst [smem:[#allocation31_spill]] %s1677_s29  ;;  %p347_p4 = scmp.eq.s32.totalorder %s1059_s13, 3 }
  0x1f   : > { %p1060_p5 = scmp.ge.s32.totalorder %s1681_s30, 1  ;;  %p1832_p6 = por %p341_p2, %p340_p1 }
  0x20   : > { %p354_p7 = scmp.lt.s32.totalorder %s1681_s30, 5  ;;  %p1837_p8 = por %p347_p4, %p346_p3 }
  0x21   : > { %s2183_s14 = scalar_select %p1832_p6, 1, 0 }
  0x22   : > { %s2185_s15 = scalar_select %p1837_p8, 1, 0 }
  0x23   : > { %2184 = sst [smem:[#allocation32_spill]] %s2183_s14  ;;  %p1841_p9 = pnand %p1060_p5, %p354_p7 }
  0x24   : > { %2186 = sst [smem:[#allocation33_spill]] %s2185_s15  ;;  %s1683_s14 = smov [#allocation12]  }
  0x25   : > { %s2188_s3 = sld [smem:[#allocation44_spill]]  ;;  %p1141_p10 = pneg %p1841_p9 }
  0x26   : > { %s367_s15 = sshll.u32 %s1683_s14, 4  ;;  %s2152_s17 = smov 64   ;;  %s368_s15 = int_to_ptr.vmem [resolvable:$true] %s367_s15 }
  0x27   : > { %p1852_p11 = pnand %p1141_p10, %p83_p0  ;;  %s2154_s13 = smov 4  }
  0x28   : > { %s58_s14 = sadd.s32 1, %s1677_s29  ;;  %s69_s8 = sadd.s32 1, %s1661_s25 }
  0x29   : > { %p76_p13 = scmp.ne.s32.totalorder %s1661_s25, %s1657_s24  ;;  %p77_p1 = scmp.eq.s32.totalorder %s1681_s30, 0 }
  0x2a   : > { %p82_p4 = scmp.ne.s32.totalorder %s1657_s24, %s1653_s23  ;;  %p288_p10 = scmp.ne.s32.totalorder %s1649_s22, %s1645_s21 }
  0x2b   : > { %s365_s11 = sshll.u32 %s2188_s3, 4  ;;  %s50_s3 = sadd.s32 1, %s1673_s28  ;;  %s366_s11 = int_to_ptr.hbm [resolvable:$true] %s365_s11 }
  0x2c   : > { %1144 = dma.hbm_to_vmem [thread:$0]  (!%p1852_p11), %s366_s11, 128, %s368_s15, [#allocation13], %s2152_s17, %s2152_s17, %s2154_s13  }
  0x2d   : > { %p52_p12 = scmp.ge.s32.totalorder %s50_s3, 2  ;;  %p1874_p2 = por %p77_p1, %p76_p13 }
  0x2e   : > { %s281_s17 = sadd.s32 1, %s1649_s22  ;;  %p1885_p7 = por %p83_p0, %p82_p4 }
  0x2f   : > { %s2245_s3 = smov (%p52_p12, %s50_s3), 0  ;;  %s2247_s14 = smov (!%p52_p12, %s58_s14), %s1677_s29 }
  0x30   : > { %2190 = sst [smem:[#allocation34_spill]] %s2245_s3  ;;  %s63_s11 = ssub.s32 %s1673_s28, %s2245_s3 }
  0x31   : > { %p60_p3 = scmp.ge.s32.totalorder %s2247_s14, 2  ;;  %p279_p5 = scmp.eq.s32.totalorder %s63_s11, 0 }
  0x32   : > { %s2193_s13 = scalar_select %p1885_p7, 1, 0 }
  0x33   : > { %s2249_s14 = smov (%p60_p3, %s2247_s14), 0  ;;  %p294_p12 = scmp.ne.s32.totalorder %s1645_s21, %s1641_s20 }
  0x34   : > { %2192 = sst [smem:[#allocation35_spill]] %s2249_s14  ;;  %s62_s3 = ssub.s32 %s1677_s29, %s2249_s14 }
  0x35   : > { %2194 = sst [smem:[#allocation36_spill]] %s2193_s13  ;;  %s64_s23 = sor.u32 %s63_s11, %s62_s3 }
  0x36   : > { %p1897_p13 = por %p288_p10, %p77_p1  ;;  %p67_p3 = scmp.eq.s32.totalorder %s64_s23, 0 }
  0x37   : > { %p1903_p8 = por %p294_p12, %p83_p0  ;;  %p328_p4 = scmp.eq.s32.totalorder %s62_s3, 0 }
  0x38   : > { %s1908_s10 = scalar_select %p279_p5, %s1649_s22, %s281_s17  }
  0x39   : > { %s2196_s4 = scalar_select %p1903_p8, 1, 0 }
  0x3a   : > { %2198 = sst [smem:[#allocation38_spill]] %s1908_s10  ;;  %s330_s20 = sadd.s32 1, %s1637_s19 }
  0x3b   : > { %2197 = sst [smem:[#allocation37_spill]] %s2196_s4  ;;  %p1171_p1 = scmp.lt.s32.totalorder %s1681_s30, 4 }
  0x3c   : > { %s1911_s26 = scalar_select %p67_p3, %s1661_s25, %s69_s8  }
  0x3d   : > { %s421_s11 = sand.u32 1, %s1681_s30   ;;  %s423_s23 = sand.u32 1, %s1661_s25  }
  0x3e   : > { %2199 = sst [smem:[#allocation39_spill]] %s1911_s26  ;;  %s1920_s18 = sshll.u32 %s423_s23, 3 }
  0x3f   : > { %s1917_s14 = scalar_select %p328_p4, %s1637_s19, %s330_s20  }
  0x40   : > { %s1066_s4 = sshll.u32 %s1677_s29, 1  ;;  %s425_s8 = scalar_lea.vmem [#allocation6], %s1920_s18 }
  0x41   : > { %2200 = sst [smem:[#allocation40_spill]] %s1917_s14  ;;  %s430_s17 = sadd.s32 %s1673_s28, %s1066_s4 }
  0x42   : > { %s1924_s10 = sshll.u32 %s430_s17, 3  ;;  %s436_s3 = sshll.u32 %s425_s8, 4  ;;  %s437_s3 = int_to_ptr.vmem [resolvable:$true] %s436_s3 }
  0x43   : > { %s2201_s0 = sld [smem:[#allocation41_spill]]  ;;  %p1935_p5 = pnand %p1171_p1, %p1874_p2 }
  0x44   : > { %p1943_p10 = pnand %p1171_p1, %p1897_p13  ;;  %s1947_s17 = scalar_lea.sflag [#allocation7], %s421_s11 }
  0x45   : > { %s2204_s1 = sld [smem:[#allocation42_spill]]  ;;  %s447_s15 = scalar_lea.vmem [#allocation9], %s1920_s18 }
  0x46   : > { %s458_s8 = sshll.u32 %s447_s15, 4  ;;  %s382_s25 = sshll.u32 %s2140_s5, 4  ;;  %s459_s8 = int_to_ptr.vmem [resolvable:$true] %s458_s8  ;;  %s383_s25 = int_to_ptr.hbm [resolvable:$true] %s382_s25 }
  0x47   : > { %s444_s14 = scalar_lea.sflag [#allocation10], %s421_s11  ;;  %s2205_s29 = smov 4  }
  0x48   : > { %s2206_s15 = smov 64   ;;  %s1687_s11 = smov [#allocation15]  }
  0x49   : > { %s432_s13 = scalar_lea.hbm %s2201_s0, %s1924_s10  ;;  %s401_s6 = sshll.u32 %s1687_s11, 4  ;;  %s402_s6 = int_to_ptr.vmem [resolvable:$true] %s401_s6 }
  0x4a   : > { %s434_s20 = sshll.u32 %s432_s13, 4  ;;  %s2207_s2 = sld [smem:[#allocation43_spill]]  ;;  %s435_s20 = int_to_ptr.hbm [resolvable:$true] %s434_s20 }
  0x4b   : > { %1154 = dma.hbm_to_vmem [thread:$0]  (!%p1935_p5), %s435_s20, 128, %s437_s3, %s1947_s17  }
  0x4c   : > { %s454_s13 = scalar_lea.hbm %s2204_s1, %s1924_s10  ;;  %s1686_s3 = smov [#allocation14]  }
  0x4d   : > { %s456_s0 = sshll.u32 %s454_s13, 4  ;;  %s384_s20 = sshll.u32 %s1686_s3, 4  ;;  %s457_s0 = int_to_ptr.hbm [resolvable:$true] %s456_s0  ;;  %s385_s20 = int_to_ptr.vmem [resolvable:$true] %s384_s20 }
  0x4e   : > { %1157 = dma.hbm_to_vmem [thread:$0]  (!%p1935_p5), %s457_s0, 128, %s459_s8, %s444_s14  }
  0x4f   : > { %s399_s13 = sshll.u32 %s2142_s7, 4  ;;  %s469_s21 = scalar_lea.vmem [#allocation11], %s1920_s18  ;;  %s400_s13 = int_to_ptr.hbm [resolvable:$true] %s399_s13 }
  0x50   : > { %1147 = dma.hbm_to_vmem [thread:$0]  (!%p1852_p11), %s383_s25, 128, %s385_s20, [#allocation13], %s2206_s15, %s2206_s15, %s2205_s29  }
  0x51   : > { %s476_s1 = scalar_lea.hbm %s2207_s2, %s1924_s10  ;;  %s480_s26 = sshll.u32 %s469_s21, 4  ;;  %s481_s26 = int_to_ptr.vmem [resolvable:$true] %s480_s26 }
  0x52   : > { %s478_s3 = sshll.u32 %s476_s1, 4  ;;  %s489_s25 = sand.u32 1, %s1649_s22   ;;  %s479_s3 = int_to_ptr.hbm [resolvable:$true] %s478_s3 }
  0x53   : > { %1150 = dma.hbm_to_vmem [thread:$0]  (!%p1852_p11), %s400_s13, 128, %s402_s6, [#allocation16], %s2206_s15, %s2206_s15, %s2205_s29  }
  0x54   : > { %1160 = dma.hbm_to_vmem [thread:$0]  (!%p1935_p5), %s479_s3, 128, %s481_s26, %s444_s14  }
  0x55   : > { %s1074_s20 = sshll.u32 %s489_s25, 3  ;;  %s1113_s11 = sshll.u32 %s1673_s28, 3 }
  0x56   : > { %s496_s1 = scalar_lea.hbm %s2144_s9, %s1113_s11  ;;  %s491_s8 = scalar_lea.vmem [#allocation17], %s1074_s20 }
  0x57   : > { %s497_s27 = sshll.u32 %s496_s1, 4  ;;  %s499_s2 = sshll.u32 %s491_s8, 4  ;;  %s498_s27 = int_to_ptr.hbm [resolvable:$true] %s497_s27  ;;  %s500_s2 = int_to_ptr.vmem [resolvable:$true] %s499_s2 }
  0x58   : > { %1163 = dma.hbm_to_vmem [thread:$0]  (!%p1943_p10), %s498_s27, 128, %s500_s2, %s1947_s17, %s2206_s15, %s2206_s15, %s2205_s29  }
  0x59   : > { %511 = sbr.rel (%p1841_p9) target bundleno = 1011 (0x3f3), region = 64  ;;  %s513_s14 = sand.u32 (!%p1841_p9), 1, %s1822_s12  }
  0x5a   : > { %s515_s23 = sand.u32 (!%p1841_p9), 1, %s1657_s24   ;;  %s514_s6 = scalar_lea.sflag (!%p1841_p9), [#allocation7], %s513_s14 }
  0x5b   : > { %s1997_s13 = sshll.u32 (!%p1841_p9), %s515_s23, 3 }
  0x5c   : > { %s517_s3 = scalar_lea.vmem (!%p1841_p9), [#allocation6], %s1997_s13 }
  0x5e   : > { %1604 = dma.done.wait (%p1885_p7), %s514_s6, 128  }
  0x5f   : > { %1606 = vsyncadd (%p1885_p7), %s514_s6, 4294967168  ;;  %s524_s2 = scalar_lea.sflag [#allocation10], %s513_s14  ;;  %s527_s16 = scalar_lea.vmem [#allocation9], %s1997_s13 }
  0x60   : > { %1608 = dma.done.wait (%p1885_p7), %s524_s2, 256  }
  0x61   : > { %1610 = vsyncadd (%p1885_p7), %s524_s2, 4294967040  ;;  %s537_s4 = scalar_lea.vmem [#allocation11], %s1997_s13 }
  0x62   : > { %1612 = dma.done.wait (%p83_p0), [#allocation13], 256  }
  0x63   : > { %1614 = vsyncadd (%p83_p0), [#allocation13], 4294967040 }
  0x64   : > { %1616 = dma.done.wait (%p83_p0), [#allocation16], 128  }
  0x65   : > { %1618 = vsyncadd (%p83_p0), [#allocation16], 4294967168  ;;  %s2209_s17 = sld [smem:[#allocation27_spill]] }
  0x6b   : > { %s560_s15 = sand.u32 1, %s2209_s17  }
  0x6c   : > { %s2019_s21 = sshll.u32 %s560_s15, 3 }
  0x6d   : > { %s562_s26 = scalar_lea.vmem [#allocation17], %s2019_s21 }
  0x6e   : > { %1620 = dma.done.wait (%p1903_p8), %s514_s6, 128  }
  0x6f   : > { %1622 = vsyncadd (%p1903_p8), %s514_s6, 4294967168  ;;  %s2211_s25 = sld [smem:[#allocation26_spill]] }
  0x70   : > { %s2212_s20 = sld [smem:[#allocation29_spill]] }
  0x75   : > { %s614_s11 = sand.u32 1, %s2211_s25  }
  0x76   : > { %p618_p9 = scmp.eq.s32.totalorder %s2212_s20, 0  ;;  %s1085_s12 = sshll.u32 %s614_s11, 3 }
  0x77   : > { %s2030_s0 = scalar_lea.vmem [#allocation18], %s1085_s12  ;;  %s2213_s27 = sld [smem:[#allocation48_spill]] (%p618_p9)  ;;  %vm628_vm0 = vcmask (%p618_p9), 261120  }
  0x78   : > { %623 = sbr.rel (!%p618_p9) target bundleno = 127 (0x7f), region = 96 }
  0x7d   : > { %v1296_v0 = vld [vmem:[%s2213_s27] ss:$0 sm:$0xff] }
  0x7e   : > { %629 = vst.msk [vmem:[%s2030_s0] sm:$0xff] %vm628_vm0, %v1296_v0 }
  0x7f PF: > { %v1115_v1 = vld [vmem:[#allocation12] sm:$0xff]  ;;  %v1116_v2 = vld [vmem:[#allocation14] sm:$0xff]  ;;  %v633_v3 = vld [vmem:[%s517_s3] sm:$0xff]  ;;  %vm647_vm1 = vcmask 130048   ;;  %s2214_s14 = sld [smem:[#allocation45_spill]]  ;;  %vm666_vm2 = vcmask 125952  }
  0x80   : > { %v634_v4 = vpack.c.bf16 %v633_v3, %v633_v3  ;;  %v672_v5 = vld [vmem:[%s527_s16] sm:$0xff]  ;;  %658 = vmatpush.bf16.msra.mxu0 %v1115_v1  ;;  %699 = vmatpush.bf16.msra.mxu1 %v1116_v2  ;;  %s2215_s2 = sld [smem:[#allocation46_spill]]  ;;  %v1117_v20 = vld [vmem:[#allocation15] sm:$0xff]  ;;  %vm668_vm3 = vcmask 7168   ;;  %v1688_v23 = vmov -inf   ;;  %vm756_vm4 = vcmask 64512  }
  0x81   : > { %v673_v6 = vpack.c.bf16 %v672_v5, %v672_v5  ;;  %v674_v21 = vld [vmem:[%s537_s4] sm:$0xff]  ;;  %669 = vst.msk [vmem:[#allocation3] sm:$0xff] %vm668_vm3, %v1688_v23  ;;  %728 = vmatpush.bf16.msra.mxu2 %v1117_v20  ;;  %v1689_v27 = vmov 0   ;;  %v1690_v28 = vmov 0.0   ;;  %s2216_s16 = sld [smem:[#allocation47_spill]]  ;;  %vm791_vm5 = vcmask 1043456  }
  0x82   : > { %v675_v22 = vpack.c.bf16 %v674_v21, %v674_v21  ;;  %1297 = vset.pattern.permute.xlu0 %v1689_v27  ;;  %1298 = vset.pattern.permute.xlu1 %v1689_v27  ;;  %670 = vst.msk [vmem:[#allocation4] sm:$0xff] %vm668_vm3, %v1690_v28  ;;  %v1118_v48 = vld [vmem:[%s562_s26] sm:$0xff]  ;;  %s2217_s4 = sld [smem:[#allocation30_spill]]  ;;  %s866_s10 = sshll.u32 %s2030_s0, 4  ;;  %vm850_vm6 = vcmask 261120   ;;  %s867_s10 = int_to_ptr.vmem [resolvable:$true] %s866_s10 }
  0x83   : > { %1091 = vmatmul.msk.bf16.vlgmr.msra.gmra.mxu0 %vm647_vm1, %v634_v4  ;;  %1096 = vmatmul.msk.bf16.vlgmr.msra.gmra.mxu1 %vm647_vm1, %v673_v6  ;;  %671 = vst.msk [vmem:[#allocation5] sm:$0xff] %vm647_vm1, %v1690_v28  ;;  %s2219_s26 = sld [smem:[#allocation49_spill]]  ;;  %s853_s27 = scalar_lea.sflag [#allocation8], %s614_s11 }
  0x84   : > { %1101 = vmatmul.msk.bf16.vlgmr.msra.gmra.mxu2 %vm647_vm1, %v675_v22  ;;  %1299 = vset.pattern.permute.xlu2 %v1689_v27 }
  0x85   : > { %v1300_v7 = vld [vmem:[%s2214_s14] ss:$0 sm:$0xff]  ;;  %843 = vmatpush.bf16.msrb.mxu1 %v1118_v48 }
  0x86   : > { %v1301_v8 = vld [vmem:[%s2215_s2] ss:$0 sm:$0xff] }
  0x87   : > { %v1302_v33 = vld [vmem:[%s2216_s16] ss:$0 sm:$0xff] }
  0x88   : > { %v755_v29 = vld [vmem:[#allocation3] sm:$0xff]  ;;  %s1110_s29 = sshll.u32 %s2217_s4, 3  ;;  %v823_v0 = vld [vmem:[%s2030_s0] sm:$0xff] }
  0x89   : > { %v772_v47 = vld [vmem:[#allocation4] sm:$0xff]  ;;  %s2220_s12 = smov %s2219_s26  ;;  %s864_s20 = scalar_lea.hbm %s2219_s26, %s1110_s29 }
  0x8a   : > { %v780_v56 = vld [vmem:[#allocation5] sm:$0xff]  ;;  %s868_s1 = sshll.u32 %s864_s20, 4  ;;  %s1539_s6 = scalar_lea.hbm %s2220_s12, 16  ;;  %s869_s1 = int_to_ptr.hbm [resolvable:$true] %s868_s1 }
  0x8b   : > { %s1533_s8 = sshra.s32 %s869_s1, 4  ;;  %s1534_s8 = int_to_ptr.hbm [resolvable:$true] %s1533_s8 }
  0x8c   : > { %s1535_s18 = scalar_lea.hbm %s1534_s8, 8  ;;  %p1540_p2 = scmp.lt.s32.totalorder %s1534_s8, %s2220_s12 }
  0x8d   : > { %p1536_p0 = scmp.ne.s32.totalorder %s1534_s8, %s1535_s18  ;;  %p1541_p7 = scmp.lt.s32.totalorder %s1539_s6, %s1535_s18 }
  0x8f   : > { %p1537_p8 = pnand %p1536_p0, %p1832_p6  ;;  %p1542_p12 = por %p1541_p7, %p1540_p2 }
  0x91   : > { %p1538_p11 = pneg %p1537_p8 }
  0x93   : > { %p1543_p13 = pnand %p1542_p12, %p1538_p11 }
 0x100   : > { %v660_v9 = vpop.f32.mrf.mxu0  ;;  %v701_v10 = vpop.f32.mrf.mxu1 }
 0x101   : > { %v661_v11 = vadd.f32 %v1300_v7, %v660_v9  ;;  %v702_v12 = vadd.f32 %v1301_v8, %v701_v10 }
 0x103   : > { %v664_v13 = vmul.f32 0.17677669, %v661_v11  ;;  %v705_v14 = vpack.c.bf16 %v702_v12, %v702_v12 }
 0x105   : > { %v665_v15 = vpack.c.bf16 %v664_v13, %v664_v13  ;;  %v740_v16 = vsel %vm647_vm1, %v705_v14, 0 }
 0x106   : > { %749 = vmatpush.bf16.xpose.msra.mxu3 %v740_v16 }
 0x107   : > { %667 = vst.msk [vmem:[#allocation2] sm:$0xf] %vm666_vm2, %v665_v15  ;;  %v730_v34 = vpop.f32.mrf.mxu2 }
 0x108   : > { %v662_v17 = vpop.f32.mrf.mxu0  ;;  %v703_v18 = vpop.f32.mrf.mxu1  ;;  %v731_v35 = vadd.f32 %v1302_v33, %v730_v34 }
 0x10a   : > { %v734_v36 = vpack.c.bf16 %v731_v35, %v731_v35 }
 0x10c   : > { %v793_v37 = vsel %vm791_vm5, %v734_v36, 0 }
 0x10d   : > { %802 = vmatpush.bf16.msrb.mxu0 %v793_v37 }
 0x10e   : > { %v735_v19 = vld [vmem:[#allocation2] sm:$0xf] }
 0x10f   : > { %1102 = vmatmul.msk.bf16.vlgmr.msra.gmra.mxu3 %vm647_vm1, %v735_v19  ;;  %v732_v38 = vpop.f32.mrf.mxu2 }
 0x192   : > { %v751_v24 = vpop.f32.mrf.mxu3 }
 0x193   : > { %v757_v25 = vsel %vm756_vm4, %v751_v24, -inf }
 0x194   : > { %758 = vmax.xlane.f32.xlu0 %v757_v25 }
 0x19a   : > { %v753_v26 = vpop.f32.mrf.mxu3 }
 0x207   : > { %v759_v30 = vpop.xlane.xlu0 %758 }
 0x208   : > { %v760_v31 = vmax.f32 %v755_v29, %v759_v30 }
 0x20a   : > { %v761_v32 = vsub.f32 %v755_v29, %v760_v31  ;;  %810 = vst.msk [vmem:[#allocation3] sm:$0xff] %vm668_vm3, %v760_v31  ;;  %766 = vperm.xlu0 %1297, %v760_v31  }
 0x20c   : > { %v762_v45 = vmul.f32 1.442695, %v761_v32 }
 0x27c   : > { %v767_v39 = vpop.permute.xlu0 %766 }
 0x27d   : > { %v769_v40 = vsub.f32 %v751_v24, %v767_v39 }
 0x27f   : > { %v770_v41 = vmul.f32 1.442695, %v769_v40 }
 0x281   : > { %1303 = vpow2.f32 %v770_v41 }
 0x282   : > { %1305 = vpow2.f32 %v762_v45 }
 0x287   : > { %v1304_v42 = vpop.eup %1303 }
 0x288   : > { %v774_v43 = vsel %vm756_vm4, %v1304_v42, 0.0  ;;  %v787_v44 = vpack.c.bf16 %v1304_v42, %v1304_v42  ;;  %v1306_v46 = vpop.eup %1305 }
 0x289   : > { %775 = vadd.xlane.f32.xlu1 %v774_v43  ;;  %v773_v49 = vmul.f32 %v1306_v46, %v772_v47 }
 0x28a   : > { %1103 = vmatmul.msk.bf16.vlgmr.msrb.gmra.mxu0 %vm756_vm4, %v787_v44 }
 0x2a2   : > { %783 = vperm.xlu1 %1298, %v1306_v46  }
 0x2fc   : > { %v776_v50 = vpop.xlane.xlu1 %775 }
 0x2fd   : > { %v777_v51 = vadd.f32 %v776_v50, %v773_v49 }
 0x2ff   : > { %779 = vst.msk [vmem:[#allocation4] sm:$0xff] %vm668_vm3, %v777_v51 }
 0x306   : > { %v815_v52 = vld [vmem:[#allocation4] sm:$0xff] }
 0x307   : > { %v804_v53 = vpop.f32.mrf.mxu0  ;;  %1307 = vrcp.f32 %v815_v52 }
 0x30d   : > { %v1308_v54 = vpop.eup %1307 }
 0x30e   : > { %819 = vperm.xlu2 %1299, %v1308_v54  }
 0x30f   : > { %v806_v55 = vpop.f32.mrf.mxu0 }
 0x314   : > { %v784_v57 = vpop.permute.xlu1 %783 }
 0x315   : > { %v786_v58 = vmul.f32 %v784_v57, %v780_v56 }
 0x317   : > { %v808_v59 = vadd.f32 %v804_v53, %v786_v58 }
 0x319   : > { %809 = vst.msk [vmem:[#allocation5] sm:$0xff] %vm647_vm1, %v808_v59 }
 0x320   : > { %v814_v60 = vld [vmem:[#allocation5] sm:$0xff] }
 0x368   : > { %v820_v61 = vpop.permute.xlu2 %819 }
 0x369   : > { %v822_v62 = vmul.f32 %v820_v61, %v814_v60 }
 0x36b   : > { %v824_v63 = vpack.c.bf16 %v822_v62, %v822_v62 }
 0x36d   : > { %1108 = vmatmul.msk.bf16.vlgmr.msrb.gmra.mxu1 %vm647_vm1, %v824_v63 }
 0x3ea   : > { %v845_v1 = vpop.f32.mrf.mxu1 }
 0x3eb   : > { %v849_v2 = vadd.f32 %v845_v1, %v823_v0 }
 0x3ed   : > { %851 = vst.msk [vmem:[%s2030_s0] sm:$0xff] %vm850_vm6, %v849_v2 }
 0x3ee   : > { %1546 = shalt.err (!%p1543_p13)
}
 0x3ef   : > { %1139 = dma.vmem_to_hbm [thread:$0]  (%p1832_p6), %s867_s10, 128, %s869_s1, %s853_s27  }
 0x3f2   : > { %v847_v3 = vpop.f32.mrf.mxu1 }
 0x3f3 PF: > { %s2222_s11 = sld [smem:[#allocation25_spill]]  ;;  %p1175_p3 = scmp.ge.s32.totalorder %s1681_s30, 2 }
 0x3f4   : > { %s2223_s0 = sld [smem:[#allocation33_spill]] }
 0x3f9   : > { %s880_s3 = sand.u32 1, %s2222_s11  }
 0x3fa   : > { %p2224_p4 = scmp.ne.s32.totalorder %s2223_s0, 0  ;;  %s881_s16 = scalar_lea.sflag [#allocation8], %s880_s3 }
 0x3fc   : > { %p1165_p1 = pnand %p1175_p3, %p2224_p4 }
 0x3fe   : > { %p1166_p5 = pneg %p1165_p1 }
 0x400   : > { %1624 = dma.done.wait (%p1166_p5), %s881_s16, 128  }
 0x401   : > { %1626 = vsyncadd (%p1166_p5), %s881_s16, 4294967168  ;;  %s32_s30 = sadd.s32 1, %s1681_s30   ;;  %s2226_s17 = sld [smem:[#allocation26_spill]] }
 0x402   : > { %p2088_p10 = scmp.ge.s32.totalorder %s32_s30, 6   ;;  %s2227_s29 = sld [smem:[#allocation40_spill]] }
 0x403   : > { %s2228_s20 = sld [smem:[#allocation27_spill]]  ;;  %s2235_s18 = smov %s1637_s19 }
 0x404   : > { %s2229_s15 = sld [smem:[#allocation38_spill]]  ;;  %s2237_s21 = smov %s1649_s22 }
 0x405   : > { %s2230_s26 = sld [smem:[#allocation28_spill]]  ;;  %s2239_s23 = smov %s1657_s24 }
 0x406   : > { %s2231_s25 = sld [smem:[#allocation39_spill]] }
 0x407   : > { %s2232_s27 = sld [smem:[#allocation31_spill]] }
 0x408   : > { %s2233_s10 = sld [smem:[#allocation34_spill]]  ;;  %s2236_s19 = smov %s2227_s29 }
 0x409   : > { %s2234_s1 = sld [smem:[#allocation35_spill]] }
 0x40a   : > { %s2238_s22 = smov %s2229_s15 }
 0x40b   : > { %s2240_s24 = smov %s2230_s26  ;;  %s2241_s26 = smov %s1673_s28 }
 0x40c   :  { %31 = sbr.rel (!%p2088_p10) target bundleno = 24 (0x18), region = 168 }
 0x40e   : > { %s2242_s28 = smov %s2233_s10 }
 0x40f   : > { %s2243_s29 = smov %s2234_s1 }
 0x411   :  { %887 = vsyncpa [#allocation7], 1 }
 0x412   :  { %889 = vsyncpa [#allocation7 + $0x1], 1 }
 0x413   :  { %890 = vsyncpa [#allocation10], 1 }
 0x414   :  { %892 = vsyncpa [#allocation10 + $0x1], 1 }
 0x415   :  { %893 = vsyncpa [#allocation13], 1 }
 0x416   :  { %894 = vsyncpa [#allocation16], 1 }
 0x417   :  { %895 = vsyncpa [#allocation8], 1 }
 0x418   :  { %897 = vsyncpa [#allocation8 + $0x1], 1 }

</bundles_post_ra>
